<compile_context>
chip_gen: v7x
topology: tpu7x:2x2x1
jax: 0.10.0
libtpu: 0.0.40
codegen_flags: <defaults>
</compile_context>

<pallas_src>
import jax
import jax.numpy as jnp
import numpy as np
from jax.experimental import pallas as pl
from jax.experimental.pallas import tpu as pltpu


def _sublane_multiple(dtype):
    itemsize = jnp.dtype(dtype).itemsize
    return max(8, 32 // itemsize)  # 8 for f32, 16 for bf16, 32 for int8


def _round_up(x, m):
    return ((x + m - 1) // m) * m


def _make_kernel(l, fold, prev_off, next_lo, next_hi):
    def kernel(cur_ref, prev_ref, next_ref, o_ref):
        # Bulk: token 0 + interior tokens come straight from the same segment.
        o_ref[...] = cur_ref[...]
        # Tokens [1, fold] <- previous segment (wrap).
        o_ref[:, :, 1:fold + 1, :] = prev_ref[:, :, prev_off:prev_off + fold, :]
        # Tokens [l-fold, l-1] <- next segment (wrap). Written last so it wins
        # on overlap, matching the PyTorch assignment order.
        o_ref[:, :, l - fold:, :] = next_ref[:, :, next_lo:next_hi, :]
    return kernel


def temporal_roll(x, n_segment=3, n_div=8, *, vmem_budget_bytes=12 * 1024 * 1024):
    """x: (nt, l, c); returns (nt, l, c) with TemporalRoll(v=0) applied."""
    nt, l, c = x.shape
    assert nt % n_segment == 0
    n_batch = nt // n_segment
    S = n_segment
    fold = l // n_div
    assert 1 <= fold and fold + 1 <= l, "TemporalRoll v=0 kernel expects 1 <= l//n_div < l"

    dtype = x.dtype
    itemsize = jnp.dtype(dtype).itemsize
    sub = _sublane_multiple(dtype)

    x4 = x.reshape(n_batch, S, l, c)

    # ---- prev window: a sublane-aligned head block [0, P) covering tokens [1, fold].
    P = _round_up(fold + 1, sub)
    if P >= l:
        P = l                                  # full token dim (always legal)
    prev_off = 1                               # local row of token 1 inside the block

    # ---- next window: last token block of size Q (sublane multiple) whose final
    # block covers tokens [l-fold, l).  Fall back to the full token dim if no
    # aligned block size works for this l / fold.
    Q = None
    q = _round_up(fold, sub)
    while q < l:
        r = l % q
        tail = q if r == 0 else r              # valid rows in the last block
        if tail >= fold:
            Q = q
            break
        q += sub
    if Q is None:
        Q = l
    j_next = (l + Q - 1) // Q - 1              # last block index along the token dim
    next_lo = (l - fold) - j_next * Q          # local rows of the tail window
    next_hi = l - j_next * Q

    # ---- batch blocking: largest divisor of n_batch whose double-buffered
    # in/out tiles fit the VMEM budget (budget chosen to be safe on v7x's 64 MiB).
    per_batch_bytes = 2 * c * (2 * l + P + Q) * itemsize   # 2x = double buffering
    cap = max(1, vmem_budget_bytes // max(per_batch_bytes, 1))
    Bb = 1
    for d in range(1, n_batch + 1):
        if n_batch % d == 0 and d <= cap:
            Bb = d
    grid = (n_batch // Bb, S)

    cur_spec = pl.BlockSpec((Bb, 1, l, c), lambda b, t: (b, t, 0, 0))
    prev_spec = pl.BlockSpec((Bb, 1, P, c), lambda b, t: (b, (t - 1 + S) % S, 0, 0))
    next_spec = pl.BlockSpec((Bb, 1, Q, c), lambda b, t: (b, (t + 1) % S, j_next, 0))
    out_spec = pl.BlockSpec((Bb, 1, l, c), lambda b, t: (b, t, 0, 0))

    bytes_read = n_batch * S * c * (l + P + Q) * itemsize
    bytes_written = n_batch * S * c * l * itemsize
    cost = pl.CostEstimate(flops=0, transcendentals=0,
                           bytes_accessed=bytes_read + bytes_written)

    out4 = pl.pallas_call(
        _make_kernel(l, fold, prev_off, next_lo, next_hi),
        out_shape=jax.ShapeDtypeStruct((n_batch, S, l, c), dtype),
        grid_spec=pltpu.PrefetchScalarGridSpec(
            num_scalar_prefetch=0,
            grid=grid,
            in_specs=[cur_spec, prev_spec, next_spec],
            out_specs=out_spec,
        ),
        compiler_params=pltpu.CompilerParams(
            dimension_semantics=("parallel", "parallel"),
            vmem_limit_bytes=32 * 1024 * 1024,
        ),
        cost_estimate=cost,
    )(x4, x4, x4)

    return out4.reshape(nt, l, c)


def temporal_roll_ref(x, n_segment=3, n_div=8):
    """Pure-JAX reference mirroring the PyTorch v=0 branch."""
    nt, l, c = x.shape
    n_batch = nt // n_segment
    fold = l // n_div
    x4 = x.reshape(n_batch, n_segment, l, c)
    out = jnp.zeros_like(x4)
    out = out.at[:, :, 0].set(x4[:, :, 0])
    out = out.at[:, :, 1:fold + 1].set(jnp.roll(x4[:, :, 1:fold + 1], 1, axis=1))
    out = out.at[:, :, l - fold:].set(jnp.roll(x4[:, :, l - fold:], -1, axis=1))
    out = out.at[:, :, 1 + fold:l - fold].set(x4[:, :, 1 + fold:l - fold])
    return out.reshape(nt, l, c)


def _run_case(key, n_batch, n_segment, l, c, n_div):
    nt = n_batch * n_segment
    x = jax.random.normal(key, (nt, l, c), dtype=jnp.float32)
    out = jax.block_until_ready(temporal_roll(x, n_segment=n_segment, n_div=n_div))
    ref = temporal_roll_ref(x, n_segment=n_segment, n_div=n_div)
    assert out.shape == (nt, l, c)
    np.testing.assert_allclose(np.asarray(out), np.asarray(ref), atol=0, rtol=0)


if __name__ == "__main__":
    key = jax.random.PRNGKey(0)
    k1, k2 = jax.random.split(key)

    # Primary small config matching the module defaults.
    _run_case(k1, n_batch=2, n_segment=3, l=16, c=32, n_div=8)

    # Second config: more batches, lane-dense c, larger token dim.
    _run_case(k2, n_batch=4, n_segment=3, l=32, c=128, n_div=8)

    print("KERNEL_OK")
</pallas_src>

<mosaic_0001>
module attributes {stable_mosaic.version = 11 : i64} {
  func.func @kernel(%arg0: i32, %arg1: i32, %arg2: memref<2x1x16x32xf32, #tpu.memory_space<vmem>>, %arg3: memref<2x1x8x32xf32, #tpu.memory_space<vmem>>, %arg4: memref<2x1x8x32xf32, #tpu.memory_space<vmem>>, %arg5: memref<2x1x16x32xf32, #tpu.memory_space<vmem>>) attributes {dimension_semantics = [#tpu.dimension_semantics<parallel>, #tpu.dimension_semantics<parallel>], iteration_bounds = array<i64: 1, 3>, scalar_prefetch = 0 : i64, scratch_operands = 0 : i64, tpu.core_type = #tpu.core_type<tc>, window_params = [{transform_indices = @transform_0, window_bounds = array<i64: 2, 1, 16, 32>}, {transform_indices = @transform_1, window_bounds = array<i64: 2, 1, 8, 32>}, {transform_indices = @transform_2, window_bounds = array<i64: 2, 1, 8, 32>}, {transform_indices = @transform_3, window_bounds = array<i64: 2, 1, 16, 32>}]} {
    %c0 = arith.constant 0 : index
    %c0_0 = arith.constant 0 : index
    %c0_1 = arith.constant 0 : index
    %c0_2 = arith.constant 0 : index
    %0 = vector.load %arg2[%c0, %c0_0, %c0_1, %c0_2] : memref<2x1x16x32xf32, #tpu.memory_space<vmem>>, vector<2x1x16x32xf32>
    %c0_3 = arith.constant 0 : index
    %c0_4 = arith.constant 0 : index
    %c0_5 = arith.constant 0 : index
    %c0_6 = arith.constant 0 : index
    %1 = vector.load %arg5[%c0_3, %c0_4, %c0_5, %c0_6] : memref<2x1x16x32xf32, #tpu.memory_space<vmem>>, vector<2x1x16x32xf32>
    tpu.vector_store %arg5[%c0_3, %c0_4, %c0_5, %c0_6], %0 {strides = array<i32>} : memref<2x1x16x32xf32, #tpu.memory_space<vmem>>, vector<2x1x16x32xf32>,
    %c0_7 = arith.constant 0 : index
    %c0_8 = arith.constant 0 : index
    %c1 = arith.constant 1 : index
    %c0_9 = arith.constant 0 : index
    %2 = vector.load %arg3[%c0_7, %c0_8, %c1, %c0_9] : memref<2x1x8x32xf32, #tpu.memory_space<vmem>>, vector<2x1x2x32xf32>
    %c0_10 = arith.constant 0 : index
    %c0_11 = arith.constant 0 : index
    %c1_12 = arith.constant 1 : index
    %c0_13 = arith.constant 0 : index
    %3 = vector.load %arg5[%c0_10, %c0_11, %c1_12, %c0_13] : memref<2x1x16x32xf32, #tpu.memory_space<vmem>>, vector<2x1x2x32xf32>
    tpu.vector_store %arg5[%c0_10, %c0_11, %c1_12, %c0_13], %2 {strides = array<i32>} : memref<2x1x16x32xf32, #tpu.memory_space<vmem>>, vector<2x1x2x32xf32>,
    %c0_14 = arith.constant 0 : index
    %c0_15 = arith.constant 0 : index
    %c6 = arith.constant 6 : index
    %c0_16 = arith.constant 0 : index
    %4 = vector.load %arg4[%c0_14, %c0_15, %c6, %c0_16] : memref<2x1x8x32xf32, #tpu.memory_space<vmem>>, vector<2x1x2x32xf32>
    %c0_17 = arith.constant 0 : index
    %c0_18 = arith.constant 0 : index
    %c14 = arith.constant 14 : index
    %c0_19 = arith.constant 0 : index
    %5 = vector.load %arg5[%c0_17, %c0_18, %c14, %c0_19] : memref<2x1x16x32xf32, #tpu.memory_space<vmem>>, vector<2x1x2x32xf32>
    tpu.vector_store %arg5[%c0_17, %c0_18, %c14, %c0_19], %4 {strides = array<i32>} : memref<2x1x16x32xf32, #tpu.memory_space<vmem>>, vector<2x1x2x32xf32>,
    return
  }
  func.func @transform_0(%arg0: i32, %arg1: i32) -> (i32, i32, i32, i32) {
    %c0_i32 = arith.constant 0 : i32
    %c0_i32_0 = arith.constant 0 : i32
    %c0_i32_1 = arith.constant 0 : i32
    return %arg0, %arg1, %c0_i32, %c0_i32_0 : i32, i32, i32, i32
  }
  func.func @transform_1(%arg0: i32, %arg1: i32) -> (i32, i32, i32, i32) {
    %c1_i32 = arith.constant 1 : i32
    %0 = arith.subi %arg1, %c1_i32 : i32
    %c3_i32 = arith.constant 3 : i32
    %1 = arith.addi %0, %c3_i32 : i32
    %c3_i32_0 = arith.constant 3 : i32
    %c0_i32 = arith.constant 0 : i32
    %2 = arith.cmpi eq, %c3_i32_0, %c0_i32 : i32
    %c1_i32_1 = arith.constant 1 : i32
    %3 = arith.select %2, %c1_i32_1, %c3_i32_0 : i32
    %4 = arith.remsi %1, %3 : i32
    %c0_i32_2 = arith.constant 0 : i32
    %5 = arith.cmpi ne, %4, %c0_i32_2 : i32
    %c0_i32_3 = arith.constant 0 : i32
    %6 = arith.cmpi slt, %4, %c0_i32_3 : i32
    %c0_i32_4 = arith.constant 0 : i32
    %7 = arith.cmpi slt, %3, %c0_i32_4 : i32
    %8 = arith.xori %6, %7 : i1
    %9 = arith.andi %8, %5 : i1
    %10 = arith.addi %4, %3 : i32
    %11 = arith.select %9, %10, %4 : i32
    %c0_i32_5 = arith.constant 0 : i32
    %c0_i32_6 = arith.constant 0 : i32
    %c0_i32_7 = arith.constant 0 : i32
    return %arg0, %11, %c0_i32_5, %c0_i32_6 : i32, i32, i32, i32
  }
  func.func @transform_2(%arg0: i32, %arg1: i32) -> (i32, i32, i32, i32) {
    %c1_i32 = arith.constant 1 : i32
    %0 = arith.addi %arg1, %c1_i32 : i32
    %c3_i32 = arith.constant 3 : i32
    %c0_i32 = arith.constant 0 : i32
    %1 = arith.cmpi eq, %c3_i32, %c0_i32 : i32
    %c1_i32_0 = arith.constant 1 : i32
    %2 = arith.select %1, %c1_i32_0, %c3_i32 : i32
    %3 = arith.remsi %0, %2 : i32
    %c0_i32_1 = arith.constant 0 : i32
    %4 = arith.cmpi ne, %3, %c0_i32_1 : i32
    %c0_i32_2 = arith.constant 0 : i32
    %5 = arith.cmpi slt, %3, %c0_i32_2 : i32
    %c0_i32_3 = arith.constant 0 : i32
    %6 = arith.cmpi slt, %2, %c0_i32_3 : i32
    %7 = arith.xori %5, %6 : i1
    %8 = arith.andi %7, %4 : i1
    %9 = arith.addi %3, %2 : i32
    %10 = arith.select %8, %9, %3 : i32
    %c1_i32_4 = arith.constant 1 : i32
    %c0_i32_5 = arith.constant 0 : i32
    %c0_i32_6 = arith.constant 0 : i32
    return %arg0, %10, %c1_i32_4, %c0_i32_5 : i32, i32, i32, i32
  }
  func.func @transform_3(%arg0: i32, %arg1: i32) -> (i32, i32, i32, i32) {
    %c0_i32 = arith.constant 0 : i32
    %c0_i32_0 = arith.constant 0 : i32
    %c0_i32_1 = arith.constant 0 : i32
    return %arg0, %arg1, %c0_i32, %c0_i32_0 : i32, i32, i32, i32
  }
}

</mosaic_0001>

<bundles_post_ra>
// kernel: tpu_custom_call.1
= control target key start
LH: loop header
LB: loop body
LE: loop exit
PB: predicated region body
PF: predicated region fallthrough
CT: control target
= control target key end

     0   :  { %s1379_s0 = inlined_call_operand.hbm [shape: f32[2,3,16,32], index: 0, kind: input, shape index: {}]   ;;  %s1380_s1 = inlined_call_operand.hbm [shape: f32[2,3,16,32], index: 1, kind: input, shape index: {}]   ;;  %s1381_s2 = inlined_call_operand.hbm [shape: f32[2,3,16,32], index: 2, kind: input, shape index: {}]   ;;  %s1382_s3 = inlined_call_operand.hbm [shape: f32[2,3,16,32], index: 3, kind: output, shape index: {}]  }
   0x1   :  { %1398 = sst [smem:[#allocation30_spill]] %s1379_s0 }
   0x2   :  { %1399 = sst [smem:[#allocation31_spill]] %s1382_s3 }
   0x3   :  { %8 = vsyncpa [#allocation3], 0 }
   0x4   :  { %10 = vsyncpa [#allocation3 + $0x1], 0 }
   0x5   :  { %11 = vsyncpa [#allocation6], 0 }
   0x6   :  { %13 = vsyncpa [#allocation6 + $0x1], 0 }
   0x7   :  { %14 = vsyncpa [#allocation4], 0 }
   0x8   :  { %16 = vsyncpa [#allocation4 + $0x1], 0  ;;  %s1039_s12 = smov 0   ;;  %s1041_s13 = smov 0  }
   0x9   :  { %s1043_s14 = smov 0   ;;  %s1045_s15 = smov 0  }
   0xa   :  { %s1047_s16 = smov 0   ;;  %s1049_s17 = smov 0  }
   0xb   :  { %s1051_s18 = smov 0   ;;  %s1053_s19 = smov 0  }
   0xc   :  { %s1055_s20 = smov 0   ;;  %s1057_s21 = smov 0  }
   0xd   :  { %s1059_s22 = smov 0   ;;  %s1061_s23 = smov 0  }
   0xe LB: > { %1400 = sst [smem:[#allocation18_spill]] %s959_s13  ;;  %s1100_s24 = sadd.s32 4294967295, %s999_s23   ;;  %s999_s23 = sphi %s1061_s23, %s22_s23   ;;  %s995_s22 = sphi %s1059_s22, %s1441_s22   ;;  %s991_s21 = sphi %s1057_s21, %s1440_s21   ;;  %s987_s20 = sphi %s1055_s20, %s1439_s20   ;;  %s983_s19 = sphi %s1053_s19, %s1448_s19   ;;  %s979_s18 = sphi %s1051_s18, %s1447_s18   ;;  %s975_s17 = sphi %s1049_s17, %s1446_s17   ;;  %s971_s16 = sphi %s1047_s16, %s1445_s16   ;;  %s967_s15 = sphi %s1045_s15, %s1444_s15   ;;  %s963_s14 = sphi %s1043_s14, %s1443_s14   ;;  %s959_s13 = sphi %s1041_s13, %s1442_s13   ;;  %s955_s12 = sphi %s1039_s12, %s1435_s12  }
   0xf   : > { %1401 = sst [smem:[#allocation19_spill]] %s979_s18  ;;  %s31_s25 = sadd.s32 1, %s995_s22 }
  0x10   : > { %1402 = sst [smem:[#allocation20_spill]] %s987_s20  ;;  %s43_s26 = sadd.s32 1, %s987_s20 }
  0x11   : > { %1403 = sst [smem:[#allocation21_spill]] %s991_s21  ;;  %p32_p0 = scmp.ge.s32.totalorder %s31_s25, 3 }
  0x12   : > { %1404 = sst [smem:[#allocation22_spill]] %s995_s22  ;;  %p50_p1 = scmp.ne.s32.totalorder %s987_s20, %s983_s19 }
  0x13   : > { %p51_p2 = scmp.eq.s32.totalorder %s999_s23, 0  ;;  %p1383_p3 = scmp.ne.s32.totalorder %s983_s19, %s979_s18 }
  0x14   : > { %s1109_s27 = scalar_select %p32_p0, 0, %s31_s25  }
  0x15   : > { %p1116_p4 = por %p51_p2, %p50_p1  ;;  %p57_p5 = scmp.eq.s32.totalorder %s1100_s24, 0 }
  0x16   : > { %1405 = sst [smem:[#allocation23_spill]] %s1109_s27  ;;  %s39_s29 = ssub.s32 %s995_s22, %s1109_s27 }
  0x17   : > { %s66_s30 = sadd.s32 2, %s995_s22  ;;  %p41_p6 = scmp.eq.s32.totalorder %s39_s29, 0 }
  0x18   : > { %p1129_p7 = por %p57_p5, %p1383_p3  ;;  %s68_s6 = ssub.s32 0, %s66_s30 }
  0x19   : > { %s1135_s7 = scalar_select %p41_p6, %s987_s20, %s43_s26  }
  0x1a   : > { %s1407_s4 = scalar_select %p1129_p7, 1, 0 }
  0x1b   : > { %1408 = sst [smem:[#allocation24_spill]] %s1135_s7  ;;  %s640_s8 = smin.u32 %s68_s6, %s66_s30 }
  0x1c   : > { %824 = sdivrem.u32 %s640_s8, 3  ;;  %s80_s9 = sadd.s32 2, %s1109_s27 }
  0x1d   : > { %s82_s10 = ssub.s32 0, %s80_s9  ;;  %p106_p8 = scmp.ne.s32.totalorder %s975_s17, %s971_s16 }
  0x1e   : > { %s643_s11 = smin.u32 %s82_s10, %s80_s9  ;;  %s99_s29 = sadd.s32 1, %s975_s17 }
  0x1f   : > { %826 = sdivrem.u32 %s643_s11, 3  ;;  %p112_p9 = scmp.ne.s32.totalorder %s971_s16, %s967_s15 }
  0x20   : > { %p1145_p10 = por %p106_p8, %p51_p2  ;;  %s124_s5 = ssub.s32 0, %s31_s25 }
  0x21   : > { %p1151_p11 = por %p112_p9, %p57_p5  ;;  %s646_s30 = smin.u32 %s124_s5, %s31_s25 }
  0x22   : > { %828 = sdivrem.u32 %s646_s30, 3  ;;  %s136_s6 = sadd.s32 1, %s1109_s27 }
  0x23   : > { %s1410_s26 = scalar_select %p1151_p11, 1, 0 }
  0x24   : > { %s138_s8 = ssub.s32 0, %s136_s6  ;;  %p162_p13 = scmp.ne.s32.totalorder %s963_s14, %s959_s13 }
  0x25   : > { %s825_s9 = spop.drf %824  ;;  %s649_s10 = smin.u32 %s138_s8, %s136_s6 }
  0x26   : > { %830 = sdivrem.u32 %s649_s10, 3  ;;  %p642_p12 = scmp.lt.s32.totalorder %s825_s9, 0 }
  0x27   : > { %s78_s11 = sadd.s32 3, %s825_s9  ;;  %p1162_p0 = por %p162_p13, %p51_p2 }
  0x28   : > { %s827_s15 = spop.drf %826  ;;  %s1450_s11 = smov (!%p642_p12, %s78_s11), %s825_s9 }
  0x29   : > { %p645_p6 = scmp.lt.s32.totalorder %s827_s15, 0  ;;  %s92_s5 = sadd.s32 3, %s827_s15 }
  0x2a   : > { %p168_p12 = scmp.ne.s32.totalorder %s959_s13, %s955_s12  ;;  %p194_p13 = scmp.eq.s32.totalorder %s1100_s24, 2 }
  0x2b   : > { %s829_s7 = spop.drf %828  ;;  %s1452_s5 = smov (!%p645_p6, %s92_s5), %s827_s15 }
  0x2c   : > { %s95_s6 = ssub.s32 %s1450_s11, %s1452_s5  ;;  %p648_p9 = scmp.lt.s32.totalorder %s829_s7, 0 }
  0x2d   : > { %p97_p8 = scmp.eq.s32.totalorder %s95_s6, 0  ;;  %s134_s8 = sadd.s32 3, %s829_s7 }
  0x2e   : > { %s1454_s8 = smov (!%p648_p9, %s134_s8), %s829_s7  ;;  %p1176_p2 = por %p168_p12, %p57_p5 }
  0x2f   : > { %s831_s30 = spop.drf %830  ;;  %p1184_p6 = por %p194_p13, %p50_p1 }
  0x30   : > { %s1170_s9 = scalar_select %p97_p8, %s975_s17, %s99_s29  }
  0x31   : > { %s1413_s10 = scalar_select %p1176_p2, 1, 0 }
  0x32   : > { %1412 = sst [smem:[#allocation25_spill]] %s1170_s9  ;;  %p651_p3 = scmp.lt.s32.totalorder %s831_s30, 0 }
  0x33   : > { %1414 = sst [smem:[#allocation26_spill]] %s1413_s10  ;;  %s148_s15 = sadd.s32 3, %s831_s30 }
  0x34   : > { %s1415_s5 = scalar_select %p1184_p6, 1, 0 }
  0x35   : > { %s1417_s6 = sadd.s32 4294967294, %s999_s23   ;;  %s1456_s15 = smov (!%p651_p3, %s148_s15), %s831_s30 }
  0x36   : > { %1416 = sst [smem:[#allocation27_spill]] %s1415_s5  ;;  %p200_p11 = scmp.eq.s32.totalorder %s1417_s6, 2 }
  0x37   : > { %p1418_p8 = scmp.ne.s32.totalorder %s983_s19, %s979_s18  ;;  %s151_s7 = ssub.s32 %s1454_s8, %s1456_s15 }
  0x38   : > { %s155_s29 = sadd.s32 1, %s963_s14  ;;  %p153_p5 = scmp.eq.s32.totalorder %s151_s7, 0 }
  0x39   : > { %p1193_p9 = por %p200_p11, %p1418_p8  ;;  %p653_p12 = scmp.ge.s32.totalorder %s999_s23, 3 }
  0x3a   : > { %s1200_s27 = scalar_select %p153_p5, %s963_s14, %s155_s29  }
  0x3b   : > { %s1419_s12 = scalar_select %p1193_p9, 1, 0 }
  0x3c   : > { %1421 = sst [smem:[#allocation29_spill]] %s1200_s27  ;;  %216 = sbr.rel (%p653_p12) target bundleno = 133 (0x85), region = 16 }
  0x3d   : > { %1420 = sst [smem:[#allocation28_spill]] %s1419_s12 }
  0x43   : > { %s220_s30 = sand.u32 1, %s987_s20   ;;  %s681_s6 = sshll.u32 %s995_s22, 8 }
  0x44   : > { %s654_s9 = sshll.u32 %s220_s30, 5  ;;  %s1422_s0 = sld [smem:[#allocation30_spill]] }
  0x45   : > { %s685_s29 = scalar_select %p1116_p4, [#allocation0], [#allocation13] }
  0x46   : > { %s224_s27 = scalar_lea.vmem [#allocation2], %s654_s9  ;;  %s1001_s21 = smov 768  }
  0x47   : > { %s246_s18 = sshll.u32 %s224_s27, 4  ;;  %s238_s5 = sld [smem:[%s685_s29]]   ;;  %s247_s18 = int_to_ptr.vmem [resolvable:$true] %s246_s18 }
  0x48   : > { %686 = sst [smem:[#allocation10]] (%p1116_p4), %s1001_s21  ;;  %s1002_s20 = smov 256  }
  0x49   : > { %687 = sst [smem:[#allocation10 + $0x1]] (%p1116_p4), %s1002_s20  ;;  %s1003_s22 = smov 2  }
  0x4a   : > { %s233_s7 = scalar_lea.hbm %s1422_s0, %s681_s6  ;;  %688 = sst [smem:[#allocation10 + $0x2]] (%p1116_p4), %s1003_s22 }
  0x4b   : > { %s1004_s10 = smov 128   ;;  %s1005_s9 = smov 8  }
  0x4c   : > { %689 = sst [smem:[#allocation10 + $0x3]] (%p1116_p4), %s1004_s10  ;;  %s221_s6 = scalar_lea.sflag [#allocation3], %s220_s30 }
  0x4d   : > { %690 = sst [smem:[#allocation10 + $0x4]] (%p1116_p4), %s1004_s10  ;;  %s657_s12 = sshll.u32 %s238_s5, 26 }
  0x4e   : > { %691 = sst [smem:[#allocation10 + $0x5]] (%p1116_p4), %s1005_s9  ;;  %s658_s27 = sadd.s32 134217728, %s657_s12 }
  0x4f   : > { %s1006_s15 = smov [#allocation9]   ;;  %s269_s20 = sand.u32 1, %s999_s23  }
  0x50   : > { %692 = dma.general (%p1116_p4), %s233_s7, 512, %s247_s18, %s221_s6, %s1006_s15, [#allocation10], %s658_s27, 0  }
  0x51   : > { %s271_s21 = sand.u32 1, %s975_s17   ;;  %s682_s29 = sshll.u32 %s1450_s11, 8 }
  0x52   : > { %s659_s22 = sshll.u32 %s271_s21, 4  ;;  %s1230_s10 = scalar_lea.hbm %s1380_s1, %s682_s29 }
  0x53   : > { %s273_s5 = scalar_lea.vmem [#allocation5], %s659_s22  ;;  %s1234_s18 = scalar_lea.sflag [#allocation6], %s269_s20 }
  0x54   : > { %s297_s28 = sshll.u32 %s273_s5, 4  ;;  %s832_s30 = scalar_lea.hbm %s1230_s10, 256  ;;  %s1232_s28 = int_to_ptr.vmem [resolvable:$true] %s297_s28 }
  0x55   : > { %p833_p1 = scmp.ne.s32.totalorder %s1230_s10, %s832_s30  ;;  %s836_s0 = scalar_lea.hbm %s1380_s1, 1536 }
  0x56   : > { %p837_p11 = scmp.lt.u32.totalorder %s1230_s10, %s1380_s1  ;;  %p838_p13 = scmp.lt.u32.totalorder %s836_s0, %s832_s30 }
  0x57   : > { %p834_p3 = pnand %p833_p1, %p1145_p10  ;;  %p840_p5 = scmp.lt.u32.totalorder %s832_s30, %s1230_s10 }
  0x58   : > { %p839_p8 = por %p838_p13, %p837_p11 }
  0x59   : > { %p835_p4 = pneg %p834_p3 }
  0x5a   : > { %p841_p12 = por %p840_p5, %p839_p8 }
  0x5c   : > { %p842_p9 = pnand %p841_p12, %p835_p4 }
  0x5e   : > { %845 = shalt.err (!%p842_p9)
}
  0x5f   : > { %s846_s9 = scalar_lea.vmem %s1232_s28, 256  ;;  %s1007_s27 = smov [#allocation5]  }
  0x60   : > { %p847_p1 = scmp.ne.s32.totalorder %s1232_s28, %s846_s9  ;;  %s850_s6 = sshll.u32 %s1007_s27, 4  ;;  %s851_s6 = int_to_ptr.vmem [resolvable:$false] %s850_s6 }
  0x61   : > { %s852_s15 = scalar_lea.vmem %s851_s6, 512  ;;  %p853_p2 = scmp.lt.s32.totalorder %s1232_s28, %s851_s6 }
  0x62   : > { %p848_p3 = pnand %p847_p1, %p1145_p10  ;;  %p854_p7 = scmp.lt.s32.totalorder %s852_s15, %s846_s9 }
  0x64   : > { %p849_p6 = pneg %p848_p3  ;;  %p855_p11 = por %p854_p7, %p853_p2 }
  0x66   : > { %p856_p13 = pnand %p855_p11, %p849_p6 }
  0x68   : > { %859 = shalt.err (!%p856_p13)
}
  0x69   : > { %s1008_s20 = smov 768   ;;  %s1009_s21 = smov 128  }
  0x6a   : > { %s1010_s22 = smov 8   ;;  %s309_s29 = sand.u32 1, %s963_s14  }
  0x6b   : > { %693 = dma.hbm_to_vmem [thread:$0]  (%p1145_p10), %s1230_s10, 256, %s1232_s28, %s1234_s18, %s1008_s20, %s1009_s21, %s1010_s22  }
  0x6c   : > { %s683_s5 = sshll.u32 %s1454_s8, 8  ;;  %s665_s30 = sshll.u32 %s309_s29, 4 }
  0x6d   : > { %s554_s0 = scalar_lea.hbm %s1381_s2, %s683_s5  ;;  %s311_s12 = scalar_lea.vmem [#allocation7], %s665_s30 }
  0x6e   : > { %s1266_s13 = scalar_lea.hbm %s554_s0, 128  ;;  %s336_s9 = sshll.u32 %s311_s12, 4  ;;  %s1268_s9 = int_to_ptr.vmem [resolvable:$true] %s336_s9 }
  0x6f   : > { %s888_s3 = scalar_lea.hbm %s554_s0, 384  ;;  %s864_s28 = scalar_lea.hbm %s1381_s2, 1536 }
  0x70   : > { %p861_p7 = scmp.ne.s32.totalorder %s1266_s13, %s888_s3  ;;  %p865_p6 = scmp.lt.u32.totalorder %s1266_s13, %s1381_s2 }
  0x71   : > { %p866_p9 = scmp.lt.u32.totalorder %s864_s28, %s888_s3  ;;  %p868_p8 = scmp.lt.u32.totalorder %s888_s3, %s1266_s13 }
  0x72   : > { %p862_p10 = pnand %p861_p7, %p1162_p0 }
  0x73   : > { %p867_p4 = por %p866_p9, %p865_p6 }
  0x74   : > { %p863_p2 = pneg %p862_p10 }
  0x75   : > { %p869_p5 = por %p868_p8, %p867_p4 }
  0x77   : > { %p870_p12 = pnand %p869_p5, %p863_p2 }
  0x79   : > { %873 = shalt.err (!%p870_p12)
}
  0x7a   : > { %s874_s15 = scalar_lea.vmem %s1268_s9, 256  ;;  %s1011_s29 = smov [#allocation7]  }
  0x7b   : > { %p875_p1 = scmp.ne.s32.totalorder %s1268_s9, %s874_s15  ;;  %s878_s5 = sshll.u32 %s1011_s29, 4  ;;  %s879_s5 = int_to_ptr.vmem [resolvable:$false] %s878_s5 }
  0x7c   : > { %s880_s30 = scalar_lea.vmem %s879_s5, 512  ;;  %p881_p13 = scmp.lt.s32.totalorder %s1268_s9, %s879_s5 }
  0x7d   : > { %p876_p3 = pnand %p875_p1, %p1162_p0  ;;  %p882_p7 = scmp.lt.s32.totalorder %s880_s30, %s874_s15 }
  0x7f   : > { %p877_p11 = pneg %p876_p3  ;;  %p883_p10 = por %p882_p7, %p881_p13 }
  0x81   : > { %p884_p6 = pnand %p883_p10, %p877_p11 }
  0x83   : > { %887 = shalt.err (!%p884_p6)
}
  0x84   : > { %694 = dma.hbm_to_vmem [thread:$0]  (%p1162_p0), %s1266_s13, 256, %s1268_s9, %s1234_s18, %s1008_s20, %s1009_s21, %s1010_s22  }
  0x85 PF: > { %p671_p2 = scmp.ge.s32.totalorder %s999_s23, 1  ;;  %p344_p9 = scmp.lt.s32.totalorder %s999_s23, 4 }
  0x87   : > { %p345_p4 = pnand %p671_p2, %p344_p9 }
  0x88   : > { %s1297_s11 = sand.u32 (!%p345_p4), 1, %s983_s19   ;;  %p1423_p8 = scmp.ne.s32.totalorder (!%p345_p4), %s1407_s4, 0 }
  0x89   : > { %348 = sbr.rel (%p345_p4) target bundleno = 181 (0xb5), region = 32  ;;  %s672_s25 = sshll.u32 (!%p345_p4), %s1297_s11, 5 }
  0x8a   : > { %s351_s7 = scalar_lea.sflag (!%p345_p4), [#allocation3], %s1297_s11  ;;  %s354_s0 = scalar_lea.vmem (!%p345_p4), [#allocation2], %s672_s25 }
  0x90   : > { %938 = dma.done.wait (%p1423_p8), %s351_s7, 512  }
  0x91   : > { %940 = vsyncadd (%p1423_p8), %s351_s7, 4294966784  ;;  %s359_s18 = sand.u32 1, %s1100_s24   ;;  %s361_s20 = sand.u32 1, %s971_s16  }
  0x92   : > { %s673_s21 = sshll.u32 %s361_s20, 4  ;;  %s360_s22 = scalar_lea.sflag [#allocation6], %s359_s18 }
  0x93   : > { %s363_s13 = scalar_lea.vmem [#allocation5], %s673_s21  ;;  %p1424_p0 = scmp.ne.s32.totalorder %s1410_s26, 0 }
  0x95   : > { %942 = dma.done.wait (%p1424_p0), %s360_s22, 256  }
  0x96   : > { %944 = vsyncadd (%p1424_p0), %s360_s22, 4294967040  ;;  %s1425_s12 = sld [smem:[#allocation18_spill]]  ;;  %s1426_s9 = sld [smem:[#allocation26_spill]] }
  0x9c   : > { %s370_s3 = sand.u32 1, %s1425_s12   ;;  %p1427_p5 = scmp.ne.s32.totalorder %s1426_s9, 0 }
  0x9d   : > { %s674_s8 = sshll.u32 %s370_s3, 4 }
  0x9e   : > { %s372_s10 = scalar_lea.vmem [#allocation7], %s674_s8 }
  0x9f   : > { %946 = dma.done.wait (%p1427_p5), %s360_s22, 256  }
  0xa0   : > { %948 = vsyncadd (%p1427_p5), %s360_s22, 4294967040  ;;  %vm441_vm0 = vcmask 261120   ;;  %vm448_vm1 = vcmask 254976   ;;  %v437_v0 = vld [vmem:[%s354_s0] sm:$0xff]  ;;  %v438_v1 = vld [vmem:[%s354_s0 + $0x8] sm:$0xff]  ;;  %s404_s24 = scalar_lea.vmem [#allocation8], %s672_s25 }
  0xa1   : > { %v439_v2 = vld [vmem:[%s354_s0 + $0x10] sm:$0xff]  ;;  %442 = vst.msk [vmem:[%s404_s24] sm:$0xff] %vm441_vm0, %v437_v0  ;;  %443 = vst.msk [vmem:[%s404_s24 + $0x8] sm:$0xff] %vm441_vm0, %v438_v1  ;;  %v440_v3 = vld [vmem:[%s354_s0 + $0x18] sm:$0xff]  ;;  %s456_s4 = scalar_lea.sflag [#allocation4], %s1297_s11 }
  0xa2   : > { %444 = vst.msk [vmem:[%s404_s24 + $0x10] sm:$0xff] %vm441_vm0, %v439_v2  ;;  %v446_v4 = vld [vmem:[%s363_s13 + $0x1] sm:$0x3]  ;;  %v447_v5 = vld [vmem:[%s363_s13 + $0x9] sm:$0x3]  ;;  %445 = vst.msk [vmem:[%s404_s24 + $0x18] sm:$0xff] %vm441_vm0, %v440_v3 }
  0xa3   : > { %449 = vst.msk [vmem:[%s404_s24 + $0x1] sm:$0x3] %vm448_vm1, %v446_v4  ;;  %450 = vst.msk [vmem:[%s404_s24 + $0x11] sm:$0x3] %vm448_vm1, %v447_v5  ;;  %v451_v6 = vld [vmem:[%s372_s10 + $0x6] sm:$0x3] }
  0xa4   : > { %v452_v7 = vld [vmem:[%s372_s10 + $0xe] sm:$0x3]  ;;  %453 = vst.msk [vmem:[%s404_s24 + $0xe] sm:$0x3] %vm448_vm1, %v451_v6 }
  0xa5   : > { %454 = vst.msk [vmem:[%s404_s24 + $0x1e] sm:$0x3] %vm448_vm1, %v452_v7 }
  0xa6   : > { %s1428_s26 = sld [smem:[#allocation21_spill]]  ;;  %s1429_s28 = sld [smem:[#allocation27_spill]] }
  0xa7   : > { %s488_s6 = sshll.u32 %s404_s24, 4  ;;  %s1430_s5 = sld [smem:[#allocation31_spill]]  ;;  %s489_s6 = int_to_ptr.vmem [resolvable:$true] %s488_s6 }
  0xa8   : > { %s1012_s25 = smov 256   ;;  %s1013_s7 = smov 768  }
  0xa9   : > { %s1014_s11 = smov 2   ;;  %s1015_s0 = smov 128  }
  0xaa   : > { %s1016_s18 = smov 8   ;;  %s1017_s20 = smov [#allocation11]  }
  0xab   : > { %s1018_s21 = smov 0  }
  0xac   : > { %s684_s27 = sshll.u32 %s1428_s26, 8  ;;  %p1431_p12 = scmp.ne.s32.totalorder %s1429_s28, 0 }
  0xad   : > { %s471_s30 = scalar_lea.hbm %s1430_s5, %s684_s27 }
  0xae   : > { %698 = sst [smem:[#allocation12]] (%p1431_p12), %s1012_s25 }
  0xaf   : > { %699 = sst [smem:[#allocation12 + $0x1]] (%p1431_p12), %s1013_s7 }
  0xb0   : > { %700 = sst [smem:[#allocation12 + $0x2]] (%p1431_p12), %s1014_s11 }
  0xb1   : > { %701 = sst [smem:[#allocation12 + $0x3]] (%p1431_p12), %s1015_s0 }
  0xb2   : > { %702 = sst [smem:[#allocation12 + $0x4]] (%p1431_p12), %s1015_s0 }
  0xb3   : > { %703 = sst [smem:[#allocation12 + $0x5]] (%p1431_p12), %s1016_s18 }
  0xb4   : > { %704 = dma.general (%p1431_p12), %s489_s6, 512, %s471_s30, %s456_s4, %s1017_s20, [#allocation12], %s1018_s21, 0  }
  0xb5 PF: > { %s1432_s22 = sld [smem:[#allocation19_spill]]  ;;  %s1433_s13 = sld [smem:[#allocation28_spill]] }
  0xb6   : > { %p710_p1 = scmp.ge.s32.totalorder %s999_s23, 2 }
  0xbb   : > { %s516_s12 = sand.u32 1, %s1432_s22   ;;  %p1434_p3 = scmp.ne.s32.totalorder %s1433_s13, 0 }
  0xbc   : > { %s517_s9 = scalar_lea.sflag [#allocation4], %s516_s12 }
  0xbd   : > { %p707_p11 = pnand %p710_p1, %p1434_p3 }
  0xbf   : > { %950 = dma.done.wait (!%p707_p11), %s517_s9, 512  }
  0xc0   : > { %952 = vsyncadd (!%p707_p11), %s517_s9, 4294966784  ;;  %s22_s23 = sadd.s32 1, %s999_s23   ;;  %s1435_s12 = sld [smem:[#allocation18_spill]] }
  0xc1   : > { %p19_p13 = scmp.ge.s32.totalorder %s22_s23, 5   ;;  %s1436_s3 = sld [smem:[#allocation29_spill]] }
  0xc2   : > { %s1437_s8 = sld [smem:[#allocation25_spill]]  ;;  %s1438_s10 = sld [smem:[#allocation20_spill]] }
  0xc3   : > { %s1439_s20 = sld [smem:[#allocation24_spill]]  ;;  %s1440_s21 = sld [smem:[#allocation22_spill]] }
  0xc4   : > { %s1441_s22 = sld [smem:[#allocation23_spill]]  ;;  %s1442_s13 = smov %s963_s14 }
  0xc5   : > { %s1444_s15 = smov %s971_s16  ;;  %s1445_s16 = smov %s975_s17 }
  0xc6   : > { %s1447_s18 = smov %s983_s19  ;;  %21 = sbr.rel (!%p19_p13) target bundleno = 14 (0xe), region = 111 }
  0xc7   : > { %s1443_s14 = smov %s1436_s3 }
  0xc8   : > { %s1446_s17 = smov %s1437_s8  ;;  %s1448_s19 = smov %s1438_s10 }
  0xcd   :  { %522 = vsyncpa [#allocation3], 1 }
  0xce   :  { %524 = vsyncpa [#allocation3 + $0x1], 1 }
  0xcf   :  { %525 = vsyncpa [#allocation6], 1 }
  0xd0   :  { %527 = vsyncpa [#allocation6 + $0x1], 1 }
  0xd1   :  { %528 = vsyncpa [#allocation4], 1 }
  0xd2   :  { %530 = vsyncpa [#allocation4 + $0x1], 1 }

</bundles_post_ra>
